<compile_context>
chip_gen: v5e
topology: v5e:2x2
jax: 0.10.0
libtpu: 0.0.40
codegen_flags: <defaults>
</compile_context>

<pallas_src>
import functools

import jax
import jax.numpy as jnp
from jax import lax
from jax.experimental import pallas as pl
from jax.experimental.pallas import tpu as pltpu


# ---------------------------------------------------------------------------
# Kernel
# ---------------------------------------------------------------------------
def resnet_kernel(L, compute_dtype,
                  x_ref, wf_ref, bf_ref, rw_ref, rb_ref,
                  wl1a_ref, wl1b_ref, bl1_ref, wl2_ref, bl2_ref,
                  out_ref, h_ref):
    layer = pl.program_id(1)
    n_layers = pl.num_programs(1)

    x0 = x_ref[0]                                   # (1, W)
    W = x0.shape[-1]

    # first_layer: 1x1 conv (1 -> C) + folded BN + ReLU.  K=1 matmul is an
    # outer product -> VPU broadcast multiply.  Runs once per batch slab.
    @pl.when(layer == 0)
    def _():
        h_ref[...] = jnp.maximum(wf_ref[...] * x0 + bf_ref[...], 0.0)

    # Per-sample boundary masks as (1, W); sublane-broadcast against (C, W).
    pos = lax.broadcasted_iota(jnp.int32, (1, W), 1) % L
    left_edge = pos == 0
    right_edge = pos == (L - 1)

    def conv3(v, conv_idx):
        # kernel_size=3, padding=1 conv as THREE accumulating MXU dots over
        # the (l-1, l, l+1) shifted taps (no (3C, W) concat materialization).
        # Per-sample zero padding via the (1, W) edge masks.
        # pltpu.roll requires non-negative shifts: shift=W-1 == shift=-1.
        v_m1 = jnp.where(left_edge, 0.0, pltpu.roll(v, shift=1, axis=1))
        v_p1 = jnp.where(right_edge, 0.0, pltpu.roll(v, shift=W - 1, axis=1))
        acc = jnp.dot(rw_ref[0, 3 * conv_idx + 0], v_m1.astype(compute_dtype),
                      preferred_element_type=jnp.float32)
        acc = acc + jnp.dot(rw_ref[0, 3 * conv_idx + 1], v.astype(compute_dtype),
                            preferred_element_type=jnp.float32)
        acc = acc + jnp.dot(rw_ref[0, 3 * conv_idx + 2], v_p1.astype(compute_dtype),
                            preferred_element_type=jnp.float32)
        return acc + rb_ref[0, conv_idx]            # (C, W) f32

    # One ResBlock1D per grid step along the (streamed-weight) layer axis:
    # relu(h + conv3(relu(conv3(h)))) with BN folded into the convs.
    h = h_ref[...]
    t = jnp.maximum(conv3(h, 0), 0.0)
    t = conv3(t, 1)
    h_new = jnp.maximum(h + t, 0.0)
    h_ref[...] = h_new

    # last_layer: cat([h, x], channel) -> 1x1 conv + BN + ReLU -> 1x1 conv.
    # The concat is a split matmul; the x column and the final 1-row
    # projection run on the VPU/XLU instead of degenerate MXU shapes.
    @pl.when(layer == n_layers - 1)
    def _():
        hl = jnp.dot(wl1a_ref[...], h_new.astype(compute_dtype),
                     preferred_element_type=jnp.float32)
        hl = hl + wl1b_ref[...] * x0                # outer product (VPU)
        hl = jnp.maximum(hl + bl1_ref[...], 0.0)    # (C+1, W)
        out_ref[0] = jnp.sum(wl2_ref[...] * hl, axis=0, keepdims=True) + bl2_ref[...]


# ---------------------------------------------------------------------------
# VMEM budgeting / tile selection (generation aware)
# ---------------------------------------------------------------------------
def _round_up(v, m):
    return (v + m - 1) // m * m


def _vmem_estimate(batch_tile, L, C, wbytes):
    """Rough per-grid-step VMEM footprint (bytes) for the streamed kernel."""
    W = batch_tile * L
    f32 = 4
    cs = _round_up(C, 8)          # sublane-padded channels
    cl = _round_up(C, 128)        # lane-padded channels
    est = 0
    est += 2 * 2 * W * f32                          # x-in + out blocks (double-buffered)
    est += 2 * 6 * cs * cl * wbytes                 # streamed per-layer conv weights (x2 buffers)
    est += 2 * 2 * cs * 128 * f32                   # streamed per-layer biases (lane padded)
    est += 2 * (_round_up(C + 1, 8) * cl * wbytes + 6 * cs * 128 * f32)  # first/last-layer params
    est += cs * W * f32                             # persistent h scratch
    est += 7 * cs * W * f32                         # in-flight temporaries (taps / casts / acc)
    return est


def _pick_batch_tile(N, L, C, wbytes, budget):
    """Largest divisor of N whose lane slab fits the VMEM budget, preferring an
    even number of batch grid steps (v7x has 2 TensorCores on the parallel axis)."""
    divisors = [b for b in range(1, N + 1) if N % b == 0]
    fitting = [b for b in divisors if _vmem_estimate(b, L, C, wbytes) <= budget]
    if not fitting:
        fitting = [1]

    def rank(b):
        g = N // b
        return (g >= 2 and g % 2 == 0, b)           # parity first, then widest slab

    return max(fitting, key=rank)


# ---------------------------------------------------------------------------
# Wrapper
# ---------------------------------------------------------------------------
def clarification_resnet(x, p, batch_tile=None, use_bf16=None):
    N, cin, L = x.shape
    assert cin == 1
    layer_count = p["rw"].shape[0]
    C = p["wf"].shape[0]

    # bf16 MXU operands only when C is large enough to pack/pay off.
    if use_bf16 is None:
        use_bf16 = C >= 16
    compute_dtype = jnp.bfloat16 if use_bf16 else jnp.float32
    wbytes = jnp.dtype(compute_dtype).itemsize

    rw = p["rw"].astype(compute_dtype)              # (Lc, 6, C, C)
    rb = p["rb"]                                    # (Lc, 2, C, 1) f32
    if layer_count == 0:
        # A zero-weight / zero-bias resblock is an exact identity on the
        # post-ReLU h, so pad to one dummy layer instead of special-casing.
        rw = jnp.zeros((1, 6, C, C), compute_dtype)
        rb = jnp.zeros((1, 2, C, 1), jnp.float32)
    n_layer_steps = rw.shape[0]

    try:
        phys_vmem = int(pltpu.get_tpu_info().vmem_capacity_bytes)
    except Exception:
        phys_vmem = 64 * 1024 * 1024                # conservative: v7x per-TC VMEM

    if batch_tile is None:
        batch_tile = _pick_batch_tile(N, L, C, wbytes, budget=int(0.65 * phys_vmem))
    assert N % batch_tile == 0
    G = N // batch_tile
    W = batch_tile * L

    est = _vmem_estimate(batch_tile, L, C, wbytes)
    vmem_limit = int(min(0.85 * phys_vmem, max(32 * 1024 * 1024, 1.5 * est)))

    # Concatenate batch_tile samples on the lane axis: (G, 1, W).
    x2 = x.reshape(G, 1, W)

    def const(shape):
        n = len(shape)
        return pl.BlockSpec(shape, lambda g, l, _n=n: (0,) * _n)

    kernel = functools.partial(resnet_kernel, L, compute_dtype)
    out2 = pl.pallas_call(
        kernel,
        out_shape=jax.ShapeDtypeStruct((G, 1, W), jnp.float32),
        grid=(G, n_layer_steps),
        in_specs=[
            pl.BlockSpec((1, 1, W), lambda g, l: (g, 0, 0)),
            const(p["wf"].shape), const(p["bf"].shape),
            # Streamed per-layer residual weights/biases (indexed by the layer axis).
            pl.BlockSpec((1, 6, C, C), lambda g, l: (l, 0, 0, 0)),
            pl.BlockSpec((1, 2, C, 1), lambda g, l: (l, 0, 0, 0)),
            const(p["wl1a"].shape), const(p["wl1b"].shape),
            const(p["bl1"].shape), const(p["wl2"].shape), const(p["bl2"].shape),
        ],
        out_specs=pl.BlockSpec((1, 1, W), lambda g, l: (g, 0, 0)),
        scratch_shapes=[pltpu.VMEM((C, W), jnp.float32)],   # resident h across layers
        compiler_params=pltpu.CompilerParams(
            dimension_semantics=("parallel", "arbitrary"),
            vmem_limit_bytes=vmem_limit),
    )(x2, p["wf"], p["bf"], rw, rb,
      p["wl1a"].astype(compute_dtype), p["wl1b"], p["bl1"], p["wl2"], p["bl2"])
    return out2.reshape(N, 1, L)


# ---------------------------------------------------------------------------
# Deterministic parameter init (synthetic) with exact BN(eval) folding
# ---------------------------------------------------------------------------
def init_params(key, C, layer_count, eps=1e-5):
    keys = iter(jax.random.split(key, 16 + 16 * max(layer_count, 1)))

    def conv_init(cout, cin, k):
        bound = 1.0 / (cin * k) ** 0.5
        w = jax.random.uniform(next(keys), (cout, cin, k), jnp.float32, -bound, bound)
        b = jax.random.uniform(next(keys), (cout,), jnp.float32, -bound, bound)
        return w, b

    def bn_init(nf):
        gamma = 1.0 + 0.1 * jax.random.normal(next(keys), (nf,), jnp.float32)
        beta = 0.1 * jax.random.normal(next(keys), (nf,), jnp.float32)
        mean = 0.1 * jax.random.normal(next(keys), (nf,), jnp.float32)
        var = jnp.abs(1.0 + 0.1 * jax.random.normal(next(keys), (nf,), jnp.float32))
        return gamma, beta, mean, var

    def fold(w, b, gamma, beta, mean, var):
        s = gamma / jnp.sqrt(var + eps)
        return w * s[:, None, None], (b - mean) * s + beta

    # first layer: Conv1d(1 -> C, k=1) + BN(C)
    wf, bf = fold(*conv_init(C, 1, 1), *bn_init(C))
    p = {"wf": wf[:, :, 0], "bf": bf[:, None]}                 # (C,1), (C,1)

    # resblocks: 2x (Conv1d(C->C, k=3, pad=1) + BN(C)).  Taps stored as
    # separate (C, C) tiles: rw[i] = [w1_t-1, w1_t0, w1_t+1, w2_t-1, w2_t0, w2_t+1]
    rw, rb = [], []
    for _ in range(layer_count):
        w1, b1 = fold(*conv_init(C, C, 3), *bn_init(C))
        w2, b2 = fold(*conv_init(C, C, 3), *bn_init(C))
        taps = [w1[:, :, 0], w1[:, :, 1], w1[:, :, 2],
                w2[:, :, 0], w2[:, :, 1], w2[:, :, 2]]
        rw.append(jnp.stack(taps, axis=0))                     # (6, C, C)
        rb.append(jnp.stack([b1[:, None], b2[:, None]]))       # (2, C, 1)
    if layer_count:
        p["rw"] = jnp.stack(rw)                                # (Lc, 6, C, C)
        p["rb"] = jnp.stack(rb)                                # (Lc, 2, C, 1)
    else:
        p["rw"] = jnp.zeros((0, 6, C, C), jnp.float32)
        p["rb"] = jnp.zeros((0, 2, C, 1), jnp.float32)

    # last layer: Conv1d(C+1 -> C+1, k=1) + BN(C+1) + ReLU + Conv1d(C+1 -> 1)
    wl1, bl1 = fold(*conv_init(C + 1, C + 1, 1), *bn_init(C + 1))
    wl1 = wl1[:, :, 0]
    p["wl1a"] = wl1[:, :C]                                     # (C+1, C)
    p["wl1b"] = wl1[:, C:]                                     # (C+1, 1)
    p["bl1"] = bl1[:, None]                                    # (C+1, 1)
    wl2, bl2 = conv_init(1, C + 1, 1)
    p["wl2"] = wl2[0, :, 0][:, None]                           # (C+1, 1)
    p["bl2"] = bl2[:, None]                                    # (1, 1)
    return p


# ---------------------------------------------------------------------------
# Pure-JAX reference (same folded params) for correctness check
# ---------------------------------------------------------------------------
def ref_forward(x, p):
    layer_count = p["rw"].shape[0]

    def conv3_ref(h, w3, b):
        # w3: (3, C, C) taps for input offsets (-1, 0, +1); b: (C, 1)
        hp = jnp.pad(h, ((0, 0), (0, 0), (1, 1)))
        return (jnp.einsum("oc,ncl->nol", w3[0], hp[:, :, :-2]) +
                jnp.einsum("oc,ncl->nol", w3[1], hp[:, :, 1:-1]) +
                jnp.einsum("oc,ncl->nol", w3[2], hp[:, :, 2:]) + b)

    h = jnp.maximum(jnp.einsum("oc,ncl->nol", p["wf"], x) + p["bf"], 0.0)
    for i in range(layer_count):
        t = jnp.maximum(conv3_ref(h, p["rw"][i, 0:3], p["rb"][i, 0]), 0.0)
        t = conv3_ref(t, p["rw"][i, 3:6], p["rb"][i, 1])
        h = jnp.maximum(h + t, 0.0)
    hl = (jnp.einsum("oc,ncl->nol", p["wl1a"], h) +
          jnp.einsum("oc,ncl->nol", p["wl1b"], x) + p["bl1"])
    hl = jnp.maximum(hl, 0.0)
    return jnp.einsum("co,ncl->nol", p["wl2"], hl) + p["bl2"]


if __name__ == "__main__":
    key = jax.random.PRNGKey(0)
    kx_a, kp_a, kx_b, kp_b = jax.random.split(key, 4)

    # Config A: tiny channel count -> f32 path; tight semantic check.
    N, C, L, layer_count = 4, 8, 128, 2
    x_a = jax.random.normal(kx_a, (N, 1, L), jnp.float32)
    p_a = init_params(kp_a, C, layer_count)
    out_a = jax.block_until_ready(clarification_resnet(x_a, p_a))
    ref_a = jax.block_until_ready(ref_forward(x_a, p_a))
    assert out_a.shape == (N, 1, L), out_a.shape
    err_a = float(jnp.max(jnp.abs(out_a - ref_a)))
    assert jnp.allclose(out_a, ref_a, atol=2e-3, rtol=2e-3), err_a

    # Config B: bf16 MXU-operand path (weights pre-rounded to bf16 so the f32
    # reference shares them; the remaining diff is activation rounding only).
    N2, C2, L2, layer_count2 = 4, 32, 128, 3
    x_b = jax.random.normal(kx_b, (N2, 1, L2), jnp.float32)
    p_b = init_params(kp_b, C2, layer_count2)
    p_b["rw"] = p_b["rw"].astype(jnp.bfloat16).astype(jnp.float32)
    p_b["wl1a"] = p_b["wl1a"].astype(jnp.bfloat16).astype(jnp.float32)
    out_b = jax.block_until_ready(clarification_resnet(x_b, p_b))
    ref_b = jax.block_until_ready(ref_forward(x_b, p_b))
    assert out_b.shape == (N2, 1, L2), out_b.shape
    err_b = float(jnp.max(jnp.abs(out_b - ref_b)))
    assert jnp.allclose(out_b, ref_b, atol=5e-2, rtol=5e-2), err_b

    print("KERNEL_OK")
</pallas_src>

<mosaic_0001>
module attributes {stable_mosaic.version = 11 : i64} {
  func.func @resnet_kernel(%arg0: i32, %arg1: i32, %arg2: memref<1x1x256xf32, #tpu.memory_space<vmem>>, %arg3: memref<8x1xf32, #tpu.memory_space<vmem>>, %arg4: memref<8x1xf32, #tpu.memory_space<vmem>>, %arg5: memref<1x6x8x8xf32, #tpu.memory_space<vmem>>, %arg6: memref<1x2x8x1xf32, #tpu.memory_space<vmem>>, %arg7: memref<9x8xf32, #tpu.memory_space<vmem>>, %arg8: memref<9x1xf32, #tpu.memory_space<vmem>>, %arg9: memref<9x1xf32, #tpu.memory_space<vmem>>, %arg10: memref<9x1xf32, #tpu.memory_space<vmem>>, %arg11: memref<1x1xf32, #tpu.memory_space<vmem>>, %arg12: memref<1x1x256xf32, #tpu.memory_space<vmem>>, %arg13: memref<8x256xf32, #tpu.memory_space<vmem>>) attributes {dimension_semantics = [#tpu.dimension_semantics<parallel>, #tpu.dimension_semantics<arbitrary>], iteration_bounds = array<i64: 2, 2>, scalar_prefetch = 0 : i64, scratch_operands = 1 : i64, tpu.core_type = #tpu.core_type<tc>, window_params = [{transform_indices = @transform_0, window_bounds = array<i64: 1, 1, 256>}, {pipeline_mode = #tpu.pipeline_mode<synchronous>, transform_indices = @transform_1, window_bounds = array<i64: 8, 1>}, {pipeline_mode = #tpu.pipeline_mode<synchronous>, transform_indices = @transform_2, window_bounds = array<i64: 8, 1>}, {transform_indices = @transform_3, window_bounds = array<i64: 1, 6, 8, 8>}, {transform_indices = @transform_4, window_bounds = array<i64: 1, 2, 8, 1>}, {pipeline_mode = #tpu.pipeline_mode<synchronous>, transform_indices = @transform_5, window_bounds = array<i64: 9, 8>}, {pipeline_mode = #tpu.pipeline_mode<synchronous>, transform_indices = @transform_6, window_bounds = array<i64: 9, 1>}, {pipeline_mode = #tpu.pipeline_mode<synchronous>, transform_indices = @transform_7, window_bounds = array<i64: 9, 1>}, {pipeline_mode = #tpu.pipeline_mode<synchronous>, transform_indices = @transform_8, window_bounds = array<i64: 9, 1>}, {pipeline_mode = #tpu.pipeline_mode<synchronous>, transform_indices = @transform_9, window_bounds = array<i64: 1, 1>}, {transform_indices = @transform_10, window_bounds = array<i64: 1, 1, 256>}]} {
    %c0 = arith.constant 0 : index
    %c0_0 = arith.constant 0 : index
    %c0_1 = arith.constant 0 : index
    %0 = vector.load %arg2[%c0, %c0_0, %c0_1] : memref<1x1x256xf32, #tpu.memory_space<vmem>>, vector<1x1x256xf32>
    %1 = vector.shape_cast %0 : vector<1x1x256xf32> to vector<1x256xf32>
    %c0_i32 = arith.constant 0 : i32
    %2 = arith.cmpi eq, %arg1, %c0_i32 : i32
    %3 = arith.extui %2 : i1 to i32
    %c0_i32_2 = arith.constant 0 : i32
    %4 = arith.cmpi ne, %3, %c0_i32_2 : i32
    scf.if %4 {
      %c0_55 = arith.constant 0 : index
      %c0_56 = arith.constant 0 : index
      %86 = vector.load %arg3[%c0_55, %c0_56] : memref<8x1xf32, #tpu.memory_space<vmem>>, vector<8x1xf32>
      %87 = vector.broadcast %86 : vector<8x1xf32> to vector<8x256xf32>
      %88 = vector.broadcast %1 : vector<1x256xf32> to vector<8x256xf32>
      %89 = arith.mulf %87, %88 : vector<8x256xf32>
      %c0_57 = arith.constant 0 : index
      %c0_58 = arith.constant 0 : index
      %90 = vector.load %arg4[%c0_57, %c0_58] : memref<8x1xf32, #tpu.memory_space<vmem>>, vector<8x1xf32>
      %91 = vector.broadcast %90 : vector<8x1xf32> to vector<8x256xf32>
      %92 = arith.addf %89, %91 : vector<8x256xf32>
      %cst_59 = arith.constant 0.000000e+00 : f32
      %93 = vector.broadcast %cst_59 : f32 to vector<8x256xf32>
      %94 = arith.maximumf %92, %93 : vector<8x256xf32>
      %c0_60 = arith.constant 0 : index
      %c0_61 = arith.constant 0 : index
      %95 = vector.load %arg13[%c0_60, %c0_61] : memref<8x256xf32, #tpu.memory_space<vmem>>, vector<8x256xf32>
      tpu.vector_store %arg13[%c0_60, %c0_61], %94 {strides = array<i32>} : memref<8x256xf32, #tpu.memory_space<vmem>>, vector<8x256xf32>,
    } else {
    }
    %5 = tpu.iota {dimensions = array<i32: 1>} : vector<1x256xi32>
    %c128_i32 = arith.constant 128 : i32
    %c0_i32_3 = arith.constant 0 : i32
    %6 = arith.cmpi eq, %c128_i32, %c0_i32_3 : i32
    %c1_i32 = arith.constant 1 : i32
    %7 = arith.select %6, %c1_i32, %c128_i32 : i32
    %8 = vector.broadcast %7 : i32 to vector<1x256xi32>
    %9 = arith.remsi %5, %8 : vector<1x256xi32>
    %c0_i32_4 = arith.constant 0 : i32
    %10 = vector.broadcast %c0_i32_4 : i32 to vector<1x256xi32>
    %11 = arith.cmpi ne, %9, %10 : vector<1x256xi32>
    %c0_i32_5 = arith.constant 0 : i32
    %12 = vector.broadcast %c0_i32_5 : i32 to vector<1x256xi32>
    %13 = arith.cmpi slt, %9, %12 : vector<1x256xi32>
    %c0_i32_6 = arith.constant 0 : i32
    %14 = arith.cmpi slt, %7, %c0_i32_6 : i32
    %15 = vector.broadcast %14 : i1 to vector<1x256xi1>
    %16 = vector.broadcast %15 : vector<1x256xi1> to vector<1x256xi1>
    %17 = arith.xori %13, %16 : vector<1x256xi1>
    %18 = arith.andi %17, %11 : vector<1x256xi1>
    %19 = vector.broadcast %7 : i32 to vector<1x256xi32>
    %20 = arith.addi %9, %19 : vector<1x256xi32>
    %21 = arith.select %18, %20, %9 : vector<1x256xi1>, vector<1x256xi32>
    %c0_i32_7 = arith.constant 0 : i32
    %22 = vector.broadcast %c0_i32_7 : i32 to vector<1x256xi32>
    %23 = arith.cmpi eq, %21, %22 : vector<1x256xi32>
    %c127_i32 = arith.constant 127 : i32
    %24 = vector.broadcast %c127_i32 : i32 to vector<1x256xi32>
    %25 = arith.cmpi eq, %21, %24 : vector<1x256xi32>
    %c0_8 = arith.constant 0 : index
    %c0_9 = arith.constant 0 : index
    %26 = vector.load %arg13[%c0_8, %c0_9] : memref<8x256xf32, #tpu.memory_space<vmem>>, vector<8x256xf32>
    %c1_i32_10 = arith.constant 1 : i32
    %27 = tpu.dynamic_rotate %26 by %c1_i32_10 dim 1 : vector<8x256xf32>, i32 -> vector<8x256xf32>
    %cst = arith.constant 0.000000e+00 : f32
    %28 = vector.shape_cast %23 : vector<1x256xi1> to vector<1x256xi1>
    %29 = vector.broadcast %28 : vector<1x256xi1> to vector<8x256xi1>
    %30 = vector.broadcast %cst : f32 to vector<8x256xf32>
    %31 = arith.select %29, %30, %27 : vector<8x256xi1>, vector<8x256xf32>
    %c255_i32 = arith.constant 255 : i32
    %32 = tpu.dynamic_rotate %26 by %c255_i32 dim 1 : vector<8x256xf32>, i32 -> vector<8x256xf32>
    %cst_11 = arith.constant 0.000000e+00 : f32
    %33 = vector.shape_cast %25 : vector<1x256xi1> to vector<1x256xi1>
    %34 = vector.broadcast %33 : vector<1x256xi1> to vector<8x256xi1>
    %35 = vector.broadcast %cst_11 : f32 to vector<8x256xf32>
    %36 = arith.select %34, %35, %32 : vector<8x256xi1>, vector<8x256xf32>
    %c0_12 = arith.constant 0 : index
    %c0_13 = arith.constant 0 : index
    %c0_14 = arith.constant 0 : index
    %c0_15 = arith.constant 0 : index
    %37 = vector.load %arg5[%c0_12, %c0_13, %c0_14, %c0_15] : memref<1x6x8x8xf32, #tpu.memory_space<vmem>>, vector<1x1x8x8xf32>
    %38 = vector.shape_cast %37 : vector<1x1x8x8xf32> to vector<8x8xf32>
    %cst_16 = arith.constant dense<0.000000e+00> : vector<8x256xf32>
    %39 = tpu.matmul %38, %31, %cst_16 {dimension_numbers = #tpu.dot_dimension_numbers<[1], [0], [0], [1], [0, 0, 1, 1], [], []>} : vector<8x8xf32>, vector<8x256xf32>, vector<8x256xf32> -> vector<8x256xf32>
    %c0_17 = arith.constant 0 : index
    %c1 = arith.constant 1 : index
    %c0_18 = arith.constant 0 : index
    %c0_19 = arith.constant 0 : index
    %40 = vector.load %arg5[%c0_17, %c1, %c0_18, %c0_19] : memref<1x6x8x8xf32, #tpu.memory_space<vmem>>, vector<1x1x8x8xf32>
    %41 = vector.shape_cast %40 : vector<1x1x8x8xf32> to vector<8x8xf32>
    %cst_20 = arith.constant dense<0.000000e+00> : vector<8x256xf32>
    %42 = tpu.matmul %41, %26, %cst_20 {dimension_numbers = #tpu.dot_dimension_numbers<[1], [0], [0], [1], [0, 0, 1, 1], [], []>} : vector<8x8xf32>, vector<8x256xf32>, vector<8x256xf32> -> vector<8x256xf32>
    %43 = arith.addf %39, %42 : vector<8x256xf32>
    %c0_21 = arith.constant 0 : index
    %c2 = arith.constant 2 : index
    %c0_22 = arith.constant 0 : index
    %c0_23 = arith.constant 0 : index
    %44 = vector.load %arg5[%c0_21, %c2, %c0_22, %c0_23] : memref<1x6x8x8xf32, #tpu.memory_space<vmem>>, vector<1x1x8x8xf32>
    %45 = vector.shape_cast %44 : vector<1x1x8x8xf32> to vector<8x8xf32>
    %cst_24 = arith.constant dense<0.000000e+00> : vector<8x256xf32>
    %46 = tpu.matmul %45, %36, %cst_24 {dimension_numbers = #tpu.dot_dimension_numbers<[1], [0], [0], [1], [0, 0, 1, 1], [], []>} : vector<8x8xf32>, vector<8x256xf32>, vector<8x256xf32> -> vector<8x256xf32>
    %47 = arith.addf %43, %46 : vector<8x256xf32>
    %c0_25 = arith.constant 0 : index
    %c0_26 = arith.constant 0 : index
    %c0_27 = arith.constant 0 : index
    %c0_28 = arith.constant 0 : index
    %48 = vector.load %arg6[%c0_25, %c0_26, %c0_27, %c0_28] : memref<1x2x8x1xf32, #tpu.memory_space<vmem>>, vector<1x1x8x1xf32>
    %49 = vector.shape_cast %48 : vector<1x1x8x1xf32> to vector<8x1xf32>
    %50 = vector.broadcast %49 : vector<8x1xf32> to vector<8x256xf32>
    %51 = arith.addf %47, %50 : vector<8x256xf32>
    %cst_29 = arith.constant 0.000000e+00 : f32
    %52 = vector.broadcast %cst_29 : f32 to vector<8x256xf32>
    %53 = arith.maximumf %51, %52 : vector<8x256xf32>
    %c1_i32_30 = arith.constant 1 : i32
    %54 = tpu.dynamic_rotate %53 by %c1_i32_30 dim 1 : vector<8x256xf32>, i32 -> vector<8x256xf32>
    %cst_31 = arith.constant 0.000000e+00 : f32
    %55 = vector.shape_cast %23 : vector<1x256xi1> to vector<1x256xi1>
    %56 = vector.broadcast %55 : vector<1x256xi1> to vector<8x256xi1>
    %57 = vector.broadcast %cst_31 : f32 to vector<8x256xf32>
    %58 = arith.select %56, %57, %54 : vector<8x256xi1>, vector<8x256xf32>
    %c255_i32_32 = arith.constant 255 : i32
    %59 = tpu.dynamic_rotate %53 by %c255_i32_32 dim 1 : vector<8x256xf32>, i32 -> vector<8x256xf32>
    %cst_33 = arith.constant 0.000000e+00 : f32
    %60 = vector.shape_cast %25 : vector<1x256xi1> to vector<1x256xi1>
    %61 = vector.broadcast %60 : vector<1x256xi1> to vector<8x256xi1>
    %62 = vector.broadcast %cst_33 : f32 to vector<8x256xf32>
    %63 = arith.select %61, %62, %59 : vector<8x256xi1>, vector<8x256xf32>
    %c0_34 = arith.constant 0 : index
    %c3 = arith.constant 3 : index
    %c0_35 = arith.constant 0 : index
    %c0_36 = arith.constant 0 : index
    %64 = vector.load %arg5[%c0_34, %c3, %c0_35, %c0_36] : memref<1x6x8x8xf32, #tpu.memory_space<vmem>>, vector<1x1x8x8xf32>
    %65 = vector.shape_cast %64 : vector<1x1x8x8xf32> to vector<8x8xf32>
    %cst_37 = arith.constant dense<0.000000e+00> : vector<8x256xf32>
    %66 = tpu.matmul %65, %58, %cst_37 {dimension_numbers = #tpu.dot_dimension_numbers<[1], [0], [0], [1], [0, 0, 1, 1], [], []>} : vector<8x8xf32>, vector<8x256xf32>, vector<8x256xf32> -> vector<8x256xf32>
    %c0_38 = arith.constant 0 : index
    %c4 = arith.constant 4 : index
    %c0_39 = arith.constant 0 : index
    %c0_40 = arith.constant 0 : index
    %67 = vector.load %arg5[%c0_38, %c4, %c0_39, %c0_40] : memref<1x6x8x8xf32, #tpu.memory_space<vmem>>, vector<1x1x8x8xf32>
    %68 = vector.shape_cast %67 : vector<1x1x8x8xf32> to vector<8x8xf32>
    %cst_41 = arith.constant dense<0.000000e+00> : vector<8x256xf32>
    %69 = tpu.matmul %68, %53, %cst_41 {dimension_numbers = #tpu.dot_dimension_numbers<[1], [0], [0], [1], [0, 0, 1, 1], [], []>} : vector<8x8xf32>, vector<8x256xf32>, vector<8x256xf32> -> vector<8x256xf32>
    %70 = arith.addf %66, %69 : vector<8x256xf32>
    %c0_42 = arith.constant 0 : index
    %c5 = arith.constant 5 : index
    %c0_43 = arith.constant 0 : index
    %c0_44 = arith.constant 0 : index
    %71 = vector.load %arg5[%c0_42, %c5, %c0_43, %c0_44] : memref<1x6x8x8xf32, #tpu.memory_space<vmem>>, vector<1x1x8x8xf32>
    %72 = vector.shape_cast %71 : vector<1x1x8x8xf32> to vector<8x8xf32>
    %cst_45 = arith.constant dense<0.000000e+00> : vector<8x256xf32>
    %73 = tpu.matmul %72, %63, %cst_45 {dimension_numbers = #tpu.dot_dimension_numbers<[1], [0], [0], [1], [0, 0, 1, 1], [], []>} : vector<8x8xf32>, vector<8x256xf32>, vector<8x256xf32> -> vector<8x256xf32>
    %74 = arith.addf %70, %73 : vector<8x256xf32>
    %c0_46 = arith.constant 0 : index
    %c1_47 = arith.constant 1 : index
    %c0_48 = arith.constant 0 : index
    %c0_49 = arith.constant 0 : index
    %75 = vector.load %arg6[%c0_46, %c1_47, %c0_48, %c0_49] : memref<1x2x8x1xf32, #tpu.memory_space<vmem>>, vector<1x1x8x1xf32>
    %76 = vector.shape_cast %75 : vector<1x1x8x1xf32> to vector<8x1xf32>
    %77 = vector.broadcast %76 : vector<8x1xf32> to vector<8x256xf32>
    %78 = arith.addf %74, %77 : vector<8x256xf32>
    %79 = arith.addf %26, %78 : vector<8x256xf32>
    %cst_50 = arith.constant 0.000000e+00 : f32
    %80 = vector.broadcast %cst_50 : f32 to vector<8x256xf32>
    %81 = arith.maximumf %79, %80 : vector<8x256xf32>
    %c0_51 = arith.constant 0 : index
    %c0_52 = arith.constant 0 : index
    %82 = vector.load %arg13[%c0_51, %c0_52] : memref<8x256xf32, #tpu.memory_space<vmem>>, vector<8x256xf32>
    tpu.vector_store %arg13[%c0_51, %c0_52], %81 {strides = array<i32>} : memref<8x256xf32, #tpu.memory_space<vmem>>, vector<8x256xf32>,
    %c1_i32_53 = arith.constant 1 : i32
    %83 = arith.cmpi eq, %arg1, %c1_i32_53 : i32
    %84 = arith.extui %83 : i1 to i32
    %c0_i32_54 = arith.constant 0 : i32
    %85 = arith.cmpi ne, %84, %c0_i32_54 : i32
    scf.if %85 {
      %c0_55 = arith.constant 0 : index
      %c0_56 = arith.constant 0 : index
      %86 = vector.load %arg7[%c0_55, %c0_56] : memref<9x8xf32, #tpu.memory_space<vmem>>, vector<9x8xf32>
      %cst_57 = arith.constant dense<0.000000e+00> : vector<9x256xf32>
      %87 = tpu.matmul %86, %81, %cst_57 {dimension_numbers = #tpu.dot_dimension_numbers<[1], [0], [0], [1], [0, 0, 1, 1], [], []>} : vector<9x8xf32>, vector<8x256xf32>, vector<9x256xf32> -> vector<9x256xf32>
      %c0_58 = arith.constant 0 : index
      %c0_59 = arith.constant 0 : index
      %88 = vector.load %arg8[%c0_58, %c0_59] : memref<9x1xf32, #tpu.memory_space<vmem>>, vector<9x1xf32>
      %89 = vector.broadcast %88 : vector<9x1xf32> to vector<9x256xf32>
      %90 = vector.broadcast %1 : vector<1x256xf32> to vector<9x256xf32>
      %91 = arith.mulf %89, %90 : vector<9x256xf32>
      %92 = arith.addf %87, %91 : vector<9x256xf32>
      %c0_60 = arith.constant 0 : index
      %c0_61 = arith.constant 0 : index
      %93 = vector.load %arg9[%c0_60, %c0_61] : memref<9x1xf32, #tpu.memory_space<vmem>>, vector<9x1xf32>
      %94 = vector.broadcast %93 : vector<9x1xf32> to vector<9x256xf32>
      %95 = arith.addf %92, %94 : vector<9x256xf32>
      %cst_62 = arith.constant 0.000000e+00 : f32
      %96 = vector.broadcast %cst_62 : f32 to vector<9x256xf32>
      %97 = arith.maximumf %95, %96 : vector<9x256xf32>
      %c0_63 = arith.constant 0 : index
      %c0_64 = arith.constant 0 : index
      %98 = vector.load %arg10[%c0_63, %c0_64] : memref<9x1xf32, #tpu.memory_space<vmem>>, vector<9x1xf32>
      %99 = vector.broadcast %98 : vector<9x1xf32> to vector<9x256xf32>
      %100 = arith.mulf %99, %97 : vector<9x256xf32>
      %cst_65 = arith.constant dense<0.000000e+00> : vector<256xf32>
      %101 = vector.multi_reduction <add>, %100, %cst_65 [0] : vector<9x256xf32> to vector<256xf32>
      %102 = vector.shape_cast %101 : vector<256xf32> to vector<1x256xf32>
      %c0_66 = arith.constant 0 : index
      %c0_67 = arith.constant 0 : index
      %103 = vector.load %arg11[%c0_66, %c0_67] : memref<1x1xf32, #tpu.memory_space<vmem>>, vector<1x1xf32>
      %104 = vector.broadcast %103 : vector<1x1xf32> to vector<1x256xf32>
      %105 = arith.addf %102, %104 : vector<1x256xf32>
      %c0_68 = arith.constant 0 : index
      %c0_69 = arith.constant 0 : index
      %c0_70 = arith.constant 0 : index
      %106 = vector.load %arg12[%c0_68, %c0_69, %c0_70] : memref<1x1x256xf32, #tpu.memory_space<vmem>>, vector<1x1x256xf32>
      %107 = vector.shape_cast %106 : vector<1x1x256xf32> to vector<1x256xf32>
      %108 = vector.shape_cast %105 : vector<1x256xf32> to vector<1x1x256xf32>
      tpu.vector_store %arg12[%c0_68, %c0_69, %c0_70], %108 {strides = array<i32>} : memref<1x1x256xf32, #tpu.memory_space<vmem>>, vector<1x1x256xf32>,
    } else {
    }
    return
  }
  func.func @transform_0(%arg0: i32, %arg1: i32) -> (i32, i32, i32) {
    %c0_i32 = arith.constant 0 : i32
    %c0_i32_0 = arith.constant 0 : i32
    %c0_i32_1 = arith.constant 0 : i32
    return %arg0, %c0_i32, %c0_i32_0 : i32, i32, i32
  }
  func.func @transform_1(%arg0: i32, %arg1: i32) -> (i32, i32) {
    %c0_i32 = arith.constant 0 : i32
    %c0_i32_0 = arith.constant 0 : i32
    %c0_i32_1 = arith.constant 0 : i32
    return %c0_i32, %c0_i32_0 : i32, i32
  }
  func.func @transform_2(%arg0: i32, %arg1: i32) -> (i32, i32) {
    %c0_i32 = arith.constant 0 : i32
    %c0_i32_0 = arith.constant 0 : i32
    %c0_i32_1 = arith.constant 0 : i32
    return %c0_i32, %c0_i32_0 : i32, i32
  }
  func.func @transform_3(%arg0: i32, %arg1: i32) -> (i32, i32, i32, i32) {
    %c0_i32 = arith.constant 0 : i32
    %c0_i32_0 = arith.constant 0 : i32
    %c0_i32_1 = arith.constant 0 : i32
    %c0_i32_2 = arith.constant 0 : i32
    return %arg1, %c0_i32, %c0_i32_0, %c0_i32_1 : i32, i32, i32, i32
  }
  func.func @transform_4(%arg0: i32, %arg1: i32) -> (i32, i32, i32, i32) {
    %c0_i32 = arith.constant 0 : i32
    %c0_i32_0 = arith.constant 0 : i32
    %c0_i32_1 = arith.constant 0 : i32
    %c0_i32_2 = arith.constant 0 : i32
    return %arg1, %c0_i32, %c0_i32_0, %c0_i32_1 : i32, i32, i32, i32
  }
  func.func @transform_5(%arg0: i32, %arg1: i32) -> (i32, i32) {
    %c0_i32 = arith.constant 0 : i32
    %c0_i32_0 = arith.constant 0 : i32
    %c0_i32_1 = arith.constant 0 : i32
    return %c0_i32, %c0_i32_0 : i32, i32
  }
  func.func @transform_6(%arg0: i32, %arg1: i32) -> (i32, i32) {
    %c0_i32 = arith.constant 0 : i32
    %c0_i32_0 = arith.constant 0 : i32
    %c0_i32_1 = arith.constant 0 : i32
    return %c0_i32, %c0_i32_0 : i32, i32
  }
  func.func @transform_7(%arg0: i32, %arg1: i32) -> (i32, i32) {
    %c0_i32 = arith.constant 0 : i32
    %c0_i32_0 = arith.constant 0 : i32
    %c0_i32_1 = arith.constant 0 : i32
    return %c0_i32, %c0_i32_0 : i32, i32
  }
  func.func @transform_8(%arg0: i32, %arg1: i32) -> (i32, i32) {
    %c0_i32 = arith.constant 0 : i32
    %c0_i32_0 = arith.constant 0 : i32
    %c0_i32_1 = arith.constant 0 : i32
    return %c0_i32, %c0_i32_0 : i32, i32
  }
  func.func @transform_9(%arg0: i32, %arg1: i32) -> (i32, i32) {
    %c0_i32 = arith.constant 0 : i32
    %c0_i32_0 = arith.constant 0 : i32
    %c0_i32_1 = arith.constant 0 : i32
    return %c0_i32, %c0_i32_0 : i32, i32
  }
  func.func @transform_10(%arg0: i32, %arg1: i32) -> (i32, i32, i32) {
    %c0_i32 = arith.constant 0 : i32
    %c0_i32_0 = arith.constant 0 : i32
    %c0_i32_1 = arith.constant 0 : i32
    return %arg0, %c0_i32, %c0_i32_0 : i32, i32, i32
  }
}

</mosaic_0001>

<bundles_post_ra>
// kernel: tpu_custom_call.1
= control target key start
LH: loop header
LB: loop body
LE: loop exit
PB: predicated region body
PF: predicated region fallthrough
CT: control target
= control target key end

     0   :  { %s1829_s0 = inlined_call_operand.vmem [shape: f32[2,1,256], index: 0, kind: input, shape index: {}]   ;;  %s1830_s1 = inlined_call_operand.vmem [shape: f32[8,1], index: 1, kind: input, shape index: {}]   ;;  %s1831_s2 = inlined_call_operand.vmem [shape: f32[8,1], index: 2, kind: input, shape index: {}]   ;;  %s1832_s3 = inlined_call_operand.hbm [shape: f32[2,6,8,8], index: 3, kind: input, shape index: {}]   ;;  %s1833_s4 = inlined_call_operand.vmem [shape: f32[2,2,8,1], index: 4, kind: input, shape index: {}]   ;;  %s1834_s5 = inlined_call_operand.vmem [shape: f32[9,8], index: 5, kind: input, shape index: {}]   ;;  %s1835_s6 = inlined_call_operand.vmem [shape: f32[9,1], index: 6, kind: input, shape index: {}]   ;;  %s1836_s7 = inlined_call_operand.vmem [shape: f32[9,1], index: 7, kind: input, shape index: {}]   ;;  %s1837_s8 = inlined_call_operand.vmem [shape: f32[9,1], index: 8, kind: input, shape index: {}]   ;;  %s1838_s9 = inlined_call_operand.<no memory space> [shape: f32[1,1], index: 9, kind: input, shape index: {}]   ;;  %s1839_s10 = inlined_call_operand.hbm [shape: f32[2,1,256], index: 10, kind: output, shape index: {}]  }
   0x1   :  { %1849 = sst [smem:[#allocation20_spill]] %s1839_s10  ;;  %v15_v0 = vstv %s1838_s9 }
   0x2   :  { %16 = vst [vmem:[#allocation3] sm:$0x1] %v15_v0 }
   0x3   :  { %17 = vsyncpa [#allocation5], 0 }
   0x4   :  { %19 = vsyncpa [#allocation5 + $0x1], 0 }
   0x5   :  { %20 = vsyncpa [#allocation6], 0 }
   0x6   :  { %22 = vsyncpa [#allocation6 + $0x1], 0  ;;  %s1505_s15 = smov 0   ;;  %s1507_s16 = smov 0  }
   0x7   :  { %s1509_s17 = smov 0   ;;  %s1511_s18 = smov 0  }
   0x8   :  { %s1513_s19 = smov 0   ;;  %s1515_s20 = smov 0  }
   0x9   :  { %s1517_s21 = smov 0   ;;  %s1519_s9 = smov 0  }
   0xa   :  { %s1521_s22 = smov 0   ;;  %s1523_s23 = smov 0  }
   0xb   :  { %s1525_s24 = smov 0  }
   0xc LB: > { %1850 = sst [smem:[#allocation10_spill]] %s1398_s15  ;;  %s1107_s25 = sadd.s32 4294967295, %s1438_s24   ;;  %s1438_s24 = sphi %s1525_s24, %s28_s24   ;;  %s1434_s23 = sphi %s1523_s23, %s1878_s23   ;;  %s1430_s22 = sphi %s1521_s22, %s1877_s22   ;;  %s1426_s9 = sphi %s1519_s9, %s1876_s9   ;;  %s1422_s21 = sphi %s1517_s21, %s1875_s21   ;;  %s1418_s20 = sphi %s1515_s20, %s1874_s20   ;;  %s1414_s19 = sphi %s1513_s19, %s1882_s19   ;;  %s1410_s18 = sphi %s1511_s18, %s1881_s18   ;;  %s1406_s17 = sphi %s1509_s17, %s1872_s17   ;;  %s1402_s16 = sphi %s1507_s16, %s1880_s16   ;;  %s1398_s15 = sphi %s1505_s15, %s1879_s15  }
   0xd   : > { %1851 = sst [smem:[#allocation11_spill]] %s1406_s17  ;;  %s1108_s26 = sadd.s32 4294967294, %s1438_s24  }
   0xe   : > { %1852 = sst [smem:[#allocation12_spill]] %s1418_s20  ;;  %s37_s27 = sadd.s32 1, %s1430_s22 }
   0xf   : > { %1853 = sst [smem:[#allocation13_spill]] %s1430_s22  ;;  %s40_s28 = sadd.s32 1, %s1434_s23 }
  0x10   : > { %1854 = sst [smem:[#allocation14_spill]] %s1434_s23  ;;  %p38_p0 = scmp.ge.s32.totalorder %s37_s27, 2 }
  0x11   : > { %s115_s29 = sadd.s32 1, %s1418_s20  ;;  %p122_p1 = scmp.ne.s32.totalorder %s1418_s20, %s1414_s19 }
  0x12   : > { %p123_p2 = scmp.eq.s32.totalorder %s1438_s24, 0  ;;  %s1884_s27 = smov (%p38_p0, %s37_s27), 0 }
  0x13   : > { %1855 = sst [smem:[#allocation15_spill]] %s1884_s27  ;;  %s1886_s28 = smov (!%p38_p0, %s40_s28), %s1434_s23 }
  0x14   : > { %s112_s30 = ssub.s32 %s1430_s22, %s1884_s27  ;;  %p1571_p3 = por %p123_p2, %p122_p1 }
  0x15   : > { %p42_p4 = scmp.ge.s32.totalorder %s1886_s28, 2  ;;  %p113_p5 = scmp.eq.s32.totalorder %s112_s30, 0 }
  0x16   : > { %p128_p6 = scmp.ne.s32.totalorder %s1414_s19, %s1410_s18  ;;  %p129_p7 = scmp.eq.s32.totalorder %s1107_s25, 0 }
  0x17   : > { %s1888_s28 = smov (%p42_p4, %s1886_s28), 0  ;;  %s272_s27 = sadd.s32 1, %s1406_s17 }
  0x18   : > { %1857 = sst [smem:[#allocation16_spill]] %s1888_s28  ;;  %p1581_p8 = por %p129_p7, %p128_p6 }
  0x19   : > { %s1579_s12 = scalar_select %p113_p5, %s1418_s20, %s115_s29  }
  0x1a   : > { %s269_s14 = ssub.s32 %s1434_s23, %s1888_s28  ;;  %p282_p10 = scmp.ne.s32.totalorder %s1406_s17, %s1402_s16 }
  0x1b   : > { %1858 = sst [smem:[#allocation17_spill]] %s1579_s12  ;;  %p270_p9 = scmp.eq.s32.totalorder %s269_s14, 0 }
  0x1c   : > { %p283_p11 = scmp.eq.s32.totalorder %s1107_s25, 3  ;;  %p288_p13 = scmp.ne.s32.totalorder %s1402_s16, %s1398_s15 }
  0x1d   : > { %s1591_s30 = scalar_select %p270_p9, %s1406_s17, %s272_s27  }
  0x1e   : > { %p1593_p12 = por %p283_p11, %p282_p10  ;;  %p289_p0 = scmp.eq.s32.totalorder %s1108_s26, 3 }
  0x1f   : > { %1860 = sst [smem:[#allocation18_spill]] %s1591_s30  ;;  %p1183_p1 = scmp.lt.s32.totalorder %s1438_s24, 4 }
  0x20   : > { %s337_s29 = sand.u32 1, %s1418_s20   ;;  %p1601_p2 = por %p289_p0, %p288_p13 }
  0x21   : > { %s1168_s14 = smul.u32 48, %s337_s29  ;;  %p1176_p4 = pnand %p1183_p1, %p1571_p3 }
  0x22   : > { %s1862_s12 = scalar_select %p1601_p2, 1, 0 }
  0x23   : > { %s1169_s25 = smul.u32 48, %s1430_s22  ;;  %s341_s30 = scalar_lea.vmem [#allocation4], %s1168_s14 }
  0x24   : > { %1863 = sst [smem:[#allocation19_spill]] %s1862_s12  ;;  %s349_s17 = sshll.u32 %s341_s30, 4  ;;  %s350_s17 = int_to_ptr.vmem [resolvable:$true] %s349_s17 }
  0x25   : > { %s346_s23 = scalar_lea.hbm %s1832_s3, %s1169_s25  ;;  %s338_s26 = scalar_lea.sflag [#allocation5], %s337_s29 }
  0x26   : > { %s347_s15 = sshll.u32 %s346_s23, 4  ;;  %s1440_s20 = smov 128   ;;  %s348_s15 = int_to_ptr.hbm [resolvable:$true] %s347_s15 }
  0x27   : > { %s1441_s10 = smov 8   ;;  %p1112_p5 = scmp.ge.s32.totalorder %s1438_s24, 1 }
  0x28   : > { %1178 = dma.hbm_to_vmem [thread:$0]  (!%p1176_p4), %s348_s15, 768, %s350_s17, %s338_s26, %s1440_s20, %s1440_s20, %s1441_s10  }
  0x29   : > { %p365_p6 = scmp.lt.s32.totalorder %s1438_s24, 5 }
  0x2b   : > { %p366_p7 = pnand %p1112_p5, %p365_p6 }
  0x2c   : > { %s371_s11 = sand.u32 (!%p366_p7), 1, %s1414_s19  }
  0x2d   : > { %369 = sbr.rel (%p366_p7) target bundleno = 912 (0x390), region = 60  ;;  %s372_s12 = scalar_lea.sflag (!%p366_p7), [#allocation5], %s371_s11 }
  0x2e   : > { %s1170_s22 = smul.u32 (!%p366_p7), 48, %s371_s11 }
  0x30   : > { %s1614_s28 = scalar_lea.vmem (!%p366_p7), [#allocation4], %s1170_s22 }
  0x32   : > { %1389 = dma.done.wait (%p1581_p8), %s372_s12, 768  }
  0x33   : > { %1391 = vsyncadd (%p1581_p8), %s372_s12, 4294966528  ;;  %p422_p3 = scmp.lt.s32.totalorder %s1426_s9, 1  ;;  %s419_s10 = sand.u32 1, %s1402_s16  }
  0x34   : > { %s1624_s15 = sshll.u32 %s419_s10, 1  ;;  %p426_p9 = scmp.lt.s32.totalorder %s1422_s21, 1 }
  0x35   : > { %s423_s17 = scalar_select %p422_p3, %s1426_s9, 1 }
  0x36   : > { %s427_s12 = scalar_select %p426_p9, %s1422_s21, 1 }
  0x37   : > { %s1114_s20 = sshll.u32 %s423_s17, 1  ;;  %s421_s27 = scalar_lea.vmem [#allocation7], %s1624_s15 }
  0x38   : > { %s425_s13 = scalar_lea.vmem %s1829_s0, %s1114_s20  ;;  %s1161_s30 = sshll.u32 %s427_s12, 4 }
  0x39   : > { %v1632_v1 = vld [vmem:[%s425_s13] sm:$0x3]  ;;  %s1637_s25 = scalar_lea.vmem %s1833_s4, %s1161_s30  ;;  %p1117_p8 = scmp.ne.s32.totalorder %s1422_s21, 0 }
  0x3b   : > { %435 = sbr.rel (%p1117_p8) target bundleno = 195 (0xc3), region = 68 }
  0x40   : > { %v436_v2 = vld [vmem:[%s1830_s1] sm:$0xff]  ;;  %v1442_v3 = vmov 0   ;;  %v443_v6 = vperm.slane %v1632_v1, 0  ;;  %v444_v7 = vperm.slane %v1632_v1, 1 }
  0x41   : > { %1280 = vset.pattern.permute.xlu0 %v1442_v3  ;;  %v449_v4 = vld [vmem:[%s1831_s2] sm:$0xff] }
  0x42   : > { %439 = vperm.xlu0 %1280, %v436_v2  }
  0x4a   : > { %452 = vperm.xlu0 %1280, %v449_v4  }
  0xb4   : > { %v440_v5 = vpop.permute.xlu0 %439 }
  0xb5   : > { %v447_v8 = vmul.f32 %v443_v6, %v440_v5  ;;  %v448_v9 = vmul.f32 %v444_v7, %v440_v5 }
  0xbc   : > { %v453_v10 = vpop.permute.xlu0 %452 }
  0xbd   : > { %v455_v11 = vadd.f32 %v453_v10, %v447_v8  ;;  %v456_v12 = vadd.f32 %v453_v10, %v448_v9 }
  0xbf   : > { %v457_v13 = vmax.f32 %v455_v11, 0.0  ;;  %v458_v14 = vmax.f32 %v456_v12, 0.0 }
  0xc1   : > { %459 = vst [vmem:[#allocation2] sm:$0xff] %v457_v13 }
  0xc2   : > { %460 = vst [vmem:[#allocation2 + $0x8] sm:$0xff] %v458_v14 }
  0xc3 PF: > { %s1443_s22 = smov 127   ;;  %s1444_s23 = smov 1   ;;  %v1118_v17 = vld [vmem:[%s1614_s28 + $0x8] sm:$0xff]  ;;  %vm523_vm0 = vcmask 64512   ;;  %v1445_v19 = vmov 0   ;;  %v461_v20 = vlaneseq  ;;  %v520_v34 = vld [vmem:[%s1614_s28] sm:$0xff] }
  0xc4   : > { %v657_v18 = vld [vmem:[%s1637_s25] sm:$0xff]  ;;  %1281 = vset.pattern.permute.xlu2 %v1445_v19  ;;  %1282 = vset.pattern.permute.xlu0 %v1445_v19  ;;  %v1151_v52 = vld [vmem:[%s1637_s25 + $0x8] sm:$0xff]  ;;  %p1152_p10 = scmp.ne.s32.totalorder %s1422_s21, 1 }
  0xc5   : > { %660 = vperm.xlu2 %1281, %v657_v18   ;;  %v1668_v21 = vand.u32 127, %v461_v20  ;;  %v1127_v35 = vld [vmem:[%s1614_s28 + $0x10] sm:$0xff]  ;;  %v1135_v51 = vld [vmem:[%s1614_s28 + $0x20] sm:$0xff]  ;;  %v1144_v59 = vld [vmem:[%s1614_s28 + $0x28] sm:$0xff] }
  0xc6   : > { %v1134_v62 = vld [vmem:[%s1614_s28 + $0x18] sm:$0xff] }
  0xc7   : > { %v463_v22 = vadd.s32 128, %v1668_v21  ;;  %vm498_vm1 = vcmp.lt.s32.totalorder %v1668_v21, 1  ;;  %vm511_vm2 = vcmp.lt.s32.totalorder %v1668_v21, 127  ;;  %vm1162_vm3 = vcmp.ne.s32.totalorder %v1668_v21, 0 }
  0xc8   : > { %v1649_v15 = vld [vmem:[#allocation2] sm:$0xff]  ;;  %vm1164_vm5 = vcmp.ne.s32.totalorder %v1668_v21, 127 }
  0xc9   : > { %507 = vrot.lane.b32.xlu1 %v1649_v15, %s1443_s22  ;;  %494 = vrot.lane.b32.xlu0 %v1649_v15, %s1444_s23  ;;  %v1655_v16 = vld [vmem:[#allocation2 + $0x8] sm:$0xff]  ;;  %v475_v25 = vand.u32 127, %v463_v22 }
  0xca   : > { %542 = vmatpush.msra.mxu0 %v1649_v15  ;;  %562 = vmatpush.msra.mxu1 %v1655_v16 }
  0xcb   : > { %1119 = vmatmul.msk.f32.vlgmr.msra.gmra.mxu0 %vm523_vm0, %v1118_v17  ;;  %1120 = vmatmul.msk.f32.vlgmr.msra.gmra.mxu1 %vm523_vm0, %v1118_v17  ;;  %vm1674_vm4 = vcmp.ne.s32.totalorder %v475_v25, 0  ;;  %vm1679_vm6 = vcmp.ne.s32.totalorder %v475_v25, 127 }
  0xd1   : > { %509 = vrot.lane.b32.xlu1 %v1655_v16, %s1443_s22  ;;  %496 = vrot.lane.b32.xlu0 %v1655_v16, %s1444_s23 }
 0x11f   : > { %v661_v44 = vpop.permute.xlu2 %660 }
 0x13b   : > { %v508_v23 = vpop.permute.xlu1 %507  ;;  %v495_v24 = vpop.permute.xlu0 %494 }
 0x143   : > { %v510_v27 = vpop.permute.xlu1 %509  ;;  %v497_v28 = vpop.permute.xlu0 %496 }
 0x144   : > { %v500_v30 = vsel %vm498_vm1, %v497_v28, %v495_v24  ;;  %v499_v31 = vsel %vm498_vm1, %v495_v24, %v497_v28  ;;  %v512_v32 = vsel %vm511_vm2, %v508_v23, %v510_v27  ;;  %v513_v33 = vsel %vm511_vm2, %v510_v27, %v508_v23 }
 0x145   : > { %1122 = vmatpush.msk.msra.mxu2 %vm1162_vm3, %v500_v30  ;;  %1125 = vmatpush.msk.msra.mxu3 %vm1674_vm4, %v499_v31 }
 0x146   : > { %1129 = vmatpush.msk.msrb.mxu0 %vm1164_vm5, %v512_v32  ;;  %1132 = vmatpush.msk.msrb.mxu1 %vm1679_vm6, %v513_v33 }
 0x147   : > { %1123 = vmatmul.msk.f32.vlgmr.msra.gmra.mxu2 %vm523_vm0, %v520_v34  ;;  %1126 = vmatmul.msk.f32.vlgmr.msra.gmra.mxu3 %vm523_vm0, %v520_v34 }
 0x148   : > { %1130 = vmatmul.msk.f32.vlgmr.msrb.gmra.mxu0 %vm523_vm0, %v1127_v35  ;;  %1133 = vmatmul.msk.f32.vlgmr.msrb.gmra.mxu1 %vm523_vm0, %v1127_v35  ;;  %v544_v36 = vpop.f32.mrf.mxu0  ;;  %v564_v37 = vpop.f32.mrf.mxu1 }
 0x1c5   : > { %v632_v38 = vpop.f32.mrf.mxu0  ;;  %v652_v39 = vpop.f32.mrf.mxu1 }
 0x1ca   : > { %v587_v40 = vpop.f32.mrf.mxu2  ;;  %v607_v41 = vpop.f32.mrf.mxu3 }
 0x1cb   : > { %v588_v42 = vadd.f32 %v587_v40, %v544_v36  ;;  %v608_v43 = vadd.f32 %v607_v41, %v564_v37 }
 0x1cd   : > { %v655_v45 = vadd.f32 %v632_v38, %v588_v42  ;;  %v656_v46 = vadd.f32 %v652_v39, %v608_v43 }
 0x1cf   : > { %v663_v47 = vadd.f32 %v661_v44, %v655_v45  ;;  %v664_v48 = vadd.f32 %v661_v44, %v656_v46 }
 0x1d1   : > { %v665_v49 = vmax.f32 %v663_v47, 0.0  ;;  %v666_v50 = vmax.f32 %v664_v48, 0.0 }
 0x1d3   : > { %667 = vrot.lane.b32.xlu1 %v665_v49, %s1444_s23  ;;  %675 = vrot.lane.b32.xlu2 %v665_v49, %s1443_s22 }
 0x1d4   : > { %705 = vmatpush.msrb.mxu2 %v665_v49  ;;  %677 = vrot.lane.b32.xlu0 %v666_v50, %s1443_s22 }
 0x1d5   : > { %725 = vmatpush.msrb.mxu3 %v666_v50  ;;  %1136 = vmatmul.msk.f32.vlgmr.msrb.gmra.mxu2 %vm523_vm0, %v1135_v51 }
 0x1d6   : > { %1137 = vmatmul.msk.f32.vlgmr.msrb.gmra.mxu3 %vm523_vm0, %v1135_v51 }
 0x1db   : > { %669 = vrot.lane.b32.xlu2 %v666_v50, %s1444_s23 }
 0x1dc   : > { %824 = vperm.xlu0 %1282, %v1151_v52  }
 0x22d   : > { %v676_v53 = vpop.permute.xlu2 %675 }
 0x235   : > { %v670_v54 = vpop.permute.xlu2 %669 }
 0x245   : > { %v668_v55 = vpop.permute.xlu1 %667 }
 0x246   : > { %v671_v56 = vsel %vm498_vm1, %v668_v55, %v670_v54  ;;  %v672_v57 = vsel %vm498_vm1, %v670_v54, %v668_v55  ;;  %v678_v58 = vpop.permute.xlu0 %677 }
 0x247   : > { %v679_v60 = vsel %vm511_vm2, %v676_v53, %v678_v58  ;;  %v680_v61 = vsel %vm511_vm2, %v678_v58, %v676_v53  ;;  %1139 = vmatpush.msk.msra.mxu0 %vm1162_vm3, %v672_v57  ;;  %1142 = vmatpush.msk.msra.mxu1 %vm1674_vm4, %v671_v56 }
 0x248   : > { %1146 = vmatpush.msk.msra.mxu2 %vm1164_vm5, %v679_v60  ;;  %1149 = vmatpush.msk.msra.mxu3 %vm1679_vm6, %v680_v61 }
 0x249   : > { %1147 = vmatmul.msk.f32.vlgmr.msra.gmra.mxu2 %vm523_vm0, %v1144_v59  ;;  %1150 = vmatmul.msk.f32.vlgmr.msra.gmra.mxu3 %vm523_vm0, %v1144_v59 }
 0x24a   : > { %1140 = vmatmul.msk.f32.vlgmr.msra.gmra.mxu0 %vm523_vm0, %v1134_v62  ;;  %1143 = vmatmul.msk.f32.vlgmr.msra.gmra.mxu1 %vm523_vm0, %v1134_v62 }
 0x24e   : > { %v825_v6 = vpop.permute.xlu0 %824 }
 0x258   : > { %v707_v63 = vpop.f32.mrf.mxu2 }
 0x259   : > { %v727_v0 = vpop.f32.mrf.mxu3 }
 0x2c7   : > { %v750_v2 = vpop.f32.mrf.mxu0  ;;  %v770_v3 = vpop.f32.mrf.mxu1 }
 0x2c8   : > { %v751_v4 = vadd.f32 %v750_v2, %v707_v63  ;;  %v771_v5 = vadd.f32 %v770_v3, %v727_v0 }
 0x2cc   : > { %v795_v7 = vpop.f32.mrf.mxu2  ;;  %v815_v8 = vpop.f32.mrf.mxu3 }
 0x2cd   : > { %v818_v9 = vadd.f32 %v795_v7, %v751_v4  ;;  %v819_v10 = vadd.f32 %v815_v8, %v771_v5 }
 0x2cf   : > { %v827_v11 = vadd.f32 %v825_v6, %v818_v9  ;;  %v828_v12 = vadd.f32 %v825_v6, %v819_v10 }
 0x2d1   : > { %v829_v13 = vadd.f32 %v827_v11, %v1649_v15  ;;  %v830_v14 = vadd.f32 %v828_v12, %v1655_v16 }
 0x2d2   : > { %838 = sbr.rel (%p1152_p10) target bundleno = 892 (0x37c), region = 72 }
 0x2d3   : > { %v831_v17 = vmax.f32 %v829_v13, 0.0  ;;  %v832_v18 = vmax.f32 %v830_v14, 0.0 }
 0x2d5   : > { %833 = vst [vmem:[#allocation2] sm:$0xff] %v831_v17 }
 0x2d6   : > { %834 = vst [vmem:[#allocation2 + $0x8] sm:$0xff] %v832_v18 }
 0x2d7   : > { %883 = vmatpush.msra.mxu0 %v831_v17  ;;  %1166 = vmatpush.msra.mxu2 %v831_v17  ;;  %v839_v19 = vld [vmem:[%s1834_s5] sm:$0xff]  ;;  %v840_v21 = vld [vmem:[%s1834_s5 + $0x8] sm:$0x1]  ;;  %v1446_v16 = vmov 0   ;;  %v967_v27 = vld [vmem:[#allocation3] sm:$0x1] }
 0x2d8   : > { %906 = vmatpush.msra.mxu1 %v832_v18  ;;  %1167 = vmatpush.msra.mxu3 %v832_v18  ;;  %v842_v15 = vld [vmem:[%s1835_s6 + $0x8] sm:$0x1]  ;;  %v841_v24 = vld [vmem:[%s1835_s6] sm:$0xff]  ;;  %v854_v30 = vperm.slane %v1632_v1, 0  ;;  %v855_v31 = vperm.slane %v1632_v1, 1  ;;  %vm950_vm7 = vcmask 1040384  }
 0x2d9   : > { %1283 = vset.pattern.permute.xlu0 %v1446_v16  ;;  %1153 = vmatmul.msk.f32.vlgmr.msra.gmra.mxu0 %vm523_vm0, %v839_v19  ;;  %v915_v22 = vld [vmem:[%s1836_s7 + $0x8] sm:$0x1]  ;;  %v914_v25 = vld [vmem:[%s1836_s7] sm:$0xff]  ;;  %vm983_vm8 = vcmp.lt.s32.totalorder %v461_v20, 256 }
 0x2da   : > { %1154 = vmatmul.msk.f32.vlgmr.msra.gmra.mxu2 %vm523_vm0, %v840_v21  ;;  %1155 = vmatmul.msk.f32.vlgmr.msra.gmra.mxu1 %vm523_vm0, %v839_v19  ;;  %v935_v23 = vld [vmem:[%s1837_s8 + $0x8] sm:$0x1]  ;;  %v934_v26 = vld [vmem:[%s1837_s8] sm:$0xff] }
 0x2db   : > { %1156 = vmatmul.msk.f32.vlgmr.msra.gmra.mxu3 %vm523_vm0, %v840_v21  ;;  %850 = vperm.xlu0 %1283, %v842_v15  }
 0x2dc   : > { %1284 = vset.pattern.permute.xlu1 %v1446_v16  ;;  %1285 = vset.pattern.permute.xlu2 %v1446_v16 }
 0x2dd   : > { %923 = vperm.xlu1 %1284, %v915_v22   ;;  %943 = vperm.xlu2 %1285, %v935_v23  }
 0x2e3   : > { %845 = vperm.xlu0 %1283, %v841_v24  }
 0x2e5   : > { %918 = vperm.xlu1 %1284, %v914_v25   ;;  %938 = vperm.xlu2 %1285, %v934_v26  }
 0x2eb   : > { %970 = vperm.xlu0 %1283, %v967_v27  }
 0x337   : > { %v944_v37 = vpop.permute.xlu2 %943 }
 0x33f   : > { %v939_v52 = vpop.permute.xlu2 %938 }
 0x34d   : > { %v851_v28 = vpop.permute.xlu0 %850 }
 0x34e   : > { %v860_v41 = vmul.f32 %v854_v30, %v851_v28  ;;  %v861_v42 = vmul.f32 %v855_v31, %v851_v28 }
 0x34f   : > { %v924_v29 = vpop.permute.xlu1 %923 }
 0x355   : > { %v846_v32 = vpop.permute.xlu0 %845 }
 0x356   : > { %v858_v33 = vmul.f32 %v854_v30, %v846_v32  ;;  %v859_v34 = vmul.f32 %v855_v31, %v846_v32  ;;  %v885_v35 = vpop.f32.mrf.mxu0 }
 0x357   : > { %v908_v36 = vpop.f32.mrf.mxu1  ;;  %v919_v40 = vpop.permute.xlu1 %918 }
 0x358   : > { %v886_v38 = vadd.f32 %v885_v35, %v858_v33  ;;  %v909_v39 = vadd.f32 %v908_v36, %v859_v34 }
 0x35a   : > { %v926_v43 = vadd.f32 %v919_v40, %v886_v38  ;;  %v927_v45 = vadd.f32 %v919_v40, %v909_v39 }
 0x35c   : > { %v930_v50 = vmax.f32 %v926_v43, 0.0  ;;  %v931_v51 = vmax.f32 %v927_v45, 0.0 }
 0x35d   : > { %v888_v44 = vpop.f32.mrf.mxu2  ;;  %v971_v8 = vpop.permute.xlu0 %970 }
 0x35e   : > { %v889_v46 = vadd.f32 %v888_v44, %v860_v41  ;;  %v911_v47 = vpop.f32.mrf.mxu3  ;;  %v946_v56 = vmul.f32 %v939_v52, %v930_v50  ;;  %v947_v58 = vmul.f32 %v939_v52, %v931_v51  ;;  %v973_v11 = vperm.slane %v971_v8, 0 }
 0x35f   : > { %v912_v48 = vadd.f32 %v911_v47, %v861_v42 }
 0x360   : > { %v928_v49 = vadd.f32 %v924_v29, %v889_v46 }
 0x361   : > { %v929_v1 = vadd.f32 %v924_v29, %v912_v48 }
 0x362   : > { %v932_v53 = vmax.f32 %v928_v49, 0.0 }
 0x363   : > { %v933_v54 = vmax.f32 %v929_v1, 0.0 }
 0x364   : > { %v948_v55 = vmul.f32 %v944_v37, %v932_v53 }
 0x365   : > { %v949_v57 = vmul.f32 %v944_v37, %v933_v54 }
 0x366   : > { %v951_v59 = vsel %vm950_vm7, %v948_v55, 0.0 }
 0x367   : > { %v952_v60 = vadd.f32 %v951_v59, %v946_v56  ;;  %v959_v61 = vsel %vm950_vm7, %v949_v57, 0.0 }
 0x368   : > { %v960_v62 = vadd.f32 %v959_v61, %v947_v58 }
 0x369   : > { %v953_v63 = vrot.slane %v952_v60, 4 }
 0x36a   : > { %v961_v0 = vrot.slane %v960_v62, 4 }
 0x36b   : > { %v954_v2 = vadd.f32 %v953_v63, %v952_v60 }
 0x36c   : > { %v962_v3 = vadd.f32 %v961_v0, %v960_v62 }
 0x36d   : > { %v955_v4 = vrot.slane %v954_v2, 2 }
 0x36e   : > { %v963_v5 = vrot.slane %v962_v3, 2 }
 0x36f   : > { %v956_v6 = vadd.f32 %v955_v4, %v954_v2 }
 0x370   : > { %v964_v7 = vadd.f32 %v963_v5, %v962_v3 }
 0x371   : > { %v957_v9 = vrot.slane %v956_v6, 1 }
 0x372   : > { %v965_v10 = vrot.slane %v964_v7, 1 }
 0x373   : > { %v958_v12 = vadd.f32 %v957_v9, %v956_v6 }
 0x374   : > { %v966_v13 = vadd.f32 %v965_v10, %v964_v7 }
 0x375   : > { %v974_v17 = vadd.f32 %v973_v11, %v958_v12 }
 0x376   : > { %v975_v14 = vadd.f32 %v973_v11, %v966_v13 }
 0x378   : > { %v978_v18 = vrot.slane %v975_v14, 7 }
 0x37a   : > { %v979_v19 = vsel %vm950_vm7, %v974_v17, %v978_v18 }
 0x37b   : > { %985 = vst.msk [vmem:[%s421_s27] sm:$0x3] %vm983_vm8, %v979_v19 }
 0x37c PF: > { %s1158_s12 = sshll.u32 %s1426_s9, 1  ;;  %s1868_s14 = sld [smem:[#allocation20_spill]] }
 0x37d   : > { %s999_s25 = sshll.u32 %s421_s27, 4  ;;  %s987_s11 = scalar_lea.sflag [#allocation6], %s419_s10  ;;  %s1000_s25 = int_to_ptr.vmem [resolvable:$true] %s999_s25 }
 0x382   : > { %s997_s21 = scalar_lea.hbm %s1868_s14, %s1158_s12  ;;  %s1336_s23 = scalar_lea.hbm %s1868_s14, 4 }
 0x383   : > { %s1001_s26 = sshll.u32 %s997_s21, 4  ;;  %s1002_s26 = int_to_ptr.hbm [resolvable:$true] %s1001_s26 }
 0x384   : > { %s1330_s17 = sshra.s32 %s1002_s26, 4  ;;  %s1331_s17 = int_to_ptr.hbm [resolvable:$true] %s1330_s17 }
 0x385   : > { %s1332_s20 = scalar_lea.hbm %s1331_s17, 2  ;;  %p1337_p1 = scmp.lt.s32.totalorder %s1331_s17, %s1868_s14 }
 0x386   : > { %p1333_p11 = scmp.ne.s32.totalorder %s1331_s17, %s1332_s20  ;;  %p1338_p4 = scmp.lt.s32.totalorder %s1336_s23, %s1332_s20 }
 0x388   : > { %p1334_p13 = pnand %p1333_p11, %p1593_p12  ;;  %p1339_p5 = por %p1338_p4, %p1337_p1 }
 0x38a   : > { %p1335_p0 = pneg %p1334_p13 }
 0x38c   : > { %p1340_p6 = pnand %p1339_p5, %p1335_p0 }
 0x38e   : > { %1343 = shalt.err (!%p1340_p6)
}
 0x38f   : > { %1173 = dma.vmem_to_hbm [thread:$0]  (%p1593_p12), %s1000_s25, 32, %s1002_s26, %s987_s11  }
 0x390 PF: > { %s1869_s10 = sld [smem:[#allocation10_spill]]  ;;  %p1184_p7 = scmp.ge.s32.totalorder %s1438_s24, 2 }
 0x392   : > { %p1180_p3 = pnand %p1184_p7, %p1601_p2 }
 0x394   : > { %p1181_p9 = pneg %p1180_p3 }
 0x396   : > { %s1013_s27 = sand.u32 1, %s1869_s10  }
 0x397   : > { %s1014_s12 = scalar_lea.sflag [#allocation6], %s1013_s27 }
 0x398   : > { %1393 = dma.done.wait (%p1181_p9), %s1014_s12, 32  }
 0x399   : > { %1395 = vsyncadd (%p1181_p9), %s1014_s12, 4294967264  ;;  %s28_s24 = sadd.s32 1, %s1438_s24   ;;  %s1871_s30 = sld [smem:[#allocation11_spill]] }
 0x39a   : > { %p25_p8 = scmp.ge.s32.totalorder %s28_s24, 6   ;;  %s1872_s17 = sld [smem:[#allocation18_spill]] }
 0x39b   : > { %s1873_s29 = sld [smem:[#allocation12_spill]]  ;;  %s1879_s15 = smov %s1402_s16 }
 0x39c   : > { %s1874_s20 = sld [smem:[#allocation17_spill]]  ;;  %s1881_s18 = smov %s1414_s19 }
 0x39d   : > { %s1875_s21 = sld [smem:[#allocation13_spill]]  ;;  %27 = sbr.rel (!%p25_p8) target bundleno = 12 (0xc), region = 125 }
 0x39e   : > { %s1876_s9 = sld [smem:[#allocation14_spill]] }
 0x39f   : > { %s1877_s22 = sld [smem:[#allocation15_spill]]  ;;  %s1880_s16 = smov %s1871_s30 }
 0x3a0   : > { %s1878_s23 = sld [smem:[#allocation16_spill]] }
 0x3a1   : > { %s1882_s19 = smov %s1873_s29 }
 0x3a2   :  { %1020 = vsyncpa [#allocation5], 1 }
 0x3a3   :  { %1022 = vsyncpa [#allocation5 + $0x1], 1 }
 0x3a4   :  { %1023 = vsyncpa [#allocation6], 1 }
 0x3a5   :  { %1025 = vsyncpa [#allocation6 + $0x1], 1 }

</bundles_post_ra>
